<compile_context>
chip_gen: v7x
topology: tpu7x:2x2x1
jax: 0.10.0
libtpu: 0.0.40
codegen_flags: <defaults>
</compile_context>

<pallas_src>
import functools

import jax
import jax.numpy as jnp
from jax.experimental import pallas as pl
from jax.experimental.pallas import tpu as pltpu


_VMEM_TARGET = 40 * 1024 * 1024      # per-step working-set target (v7x: 64 MiB/TC)
_VMEM_CEILING = 100 * 1024 * 1024    # never request more than this
_VMEM_FLOOR = 16 * 1024 * 1024
_PACK_CIN_MAX = 32                   # fold kw into K (lane-dense repack) when cin <= this
_M_PER_STEP_TARGET = 2048            # GEMM rows per grid step when batch-blocking


def _conv_relu_kernel(x_ref, w_ref, b_ref, o_ref, *, kh, kw_eff, th, owp, cin_eff):
    """One (batch-block, row-tile) grid step: valid conv + bias + ReLU.

    x_ref: (nb, H_blk, W_blk, K)           resident channels-last input (bf16)
    w_ref: (kh*kw_eff, K, Cout_pad)        resident folded weights (bf16)
    b_ref: (1, Cout_pad)                   resident bias row (f32)
    o_ref: (nb, th, owp, Cout_pad)         output tile (lane-dense Cout, f32)
    """
    nb = o_ref.shape[0]
    cpad = o_ref.shape[-1]
    m = nb * th * owp

    # First output row of this tile; alignment hint for the dynamic row slices.
    oh0 = pl.multiple_of(pl.program_id(1) * th, th)

    acc = jnp.zeros((m, cpad), jnp.float32)
    # In-kernel im2col: each tap is a shifted view of the resident image feeding an
    # (m, K) x (K, Cout_pad) MXU matmul with f32 accumulation.  No HBM traffic.
    # Reshapes are tile-aligned because owp is a multiple of 8.
    for i in range(kh):
        for j in range(kw_eff):
            sl = x_ref[:, pl.ds(oh0 + i, th), pl.ds(j, owp), :]   # (nb, th, owp, K)
            acc += jnp.dot(sl.reshape(m, cin_eff), w_ref[i * kw_eff + j],
                           preferred_element_type=jnp.float32)

    acc = jnp.maximum(acc + b_ref[...], 0.0)                      # bias + ReLU
    o_ref[...] = acc.reshape(nb, th, owp, cpad).astype(o_ref.dtype)


def _vmem_bytes(nb, h_blk, w_blk, c_blk, th, owp, cpad, n_taps, cin_eff, in_isz):
    img = nb * h_blk * w_blk * c_blk * in_isz      # per input buffer
    out = nb * th * owp * cpad * 4                 # per output buffer
    wgt = n_taps * cin_eff * cpad * in_isz         # per weight buffer
    acc = nb * th * owp * cpad * 4                 # f32 accumulator value
    lhs = 2 * nb * th * owp * cin_eff * in_isz     # slice temporaries
    return 2 * img + 2 * out + 2 * wgt + acc + lhs


def _basic_conv2d_nhwc_impl(x, weight, bias, *, block_oh, compute_dtype):
    n, h, w, cin = x.shape
    cout, cin_w, kh, kw = weight.shape
    assert cin == cin_w, "channel mismatch"
    oh, ow = h - kh + 1, w - kw + 1
    assert oh >= 1 and ow >= 1, "kernel larger than input"

    in_isz = jnp.dtype(compute_dtype).itemsize

    # ---- lane-dense Cout ----
    cout_pad = ((cout + 127) // 128) * 128

    # ---- fold kw taps into the contraction for small-cin layers ----
    pack = (kw > 1) and (cin <= _PACK_CIN_MAX)
    kw_eff = 1 if pack else kw
    cin_eff = kw * cin if pack else cin

    # ---- tile-aligned output width (makes in-kernel reshapes free) ----
    owp = ((ow + 7) // 8) * 8

    # ---- row tile: prefer a divisor of OH, shrink until VMEM fits ----
    divs = [d for d in range(1, oh + 1) if oh % d == 0 and d <= block_oh]
    th = max(divs)
    if th < min(8, oh):                  # pathological OH (large prime): pad rows
        th = min(block_oh, oh)
    while True:
        num_t = pl.cdiv(oh, th)
        oh_tiles = num_t * th
        h_blk = oh_tiles + kh - 1
        w_blk = owp if pack else owp + kw - 1
        c_blk = cin_eff if pack else cin
        est = _vmem_bytes(1, h_blk, w_blk, c_blk, th, owp, cout_pad,
                          kh * kw_eff, cin_eff, in_isz)
        if est <= _VMEM_TARGET or th <= 8:
            break
        th = max(8, th // 2)

    # ---- batch blocking: more work per step for small feature maps ----
    nb = 1
    for d in range(2, n + 1):
        if n % d:
            continue
        if d * th * owp > _M_PER_STEP_TARGET:
            break
        if (n // d) * num_t < 2:         # keep >= 2 steps for pipelining / 2 TCs
            continue
        if _vmem_bytes(d, h_blk, w_blk, c_blk, th, owp, cout_pad,
                       kh * kw_eff, cin_eff, in_isz) > _VMEM_TARGET:
            break
        nb = d

    vmem_limit = int(min(_VMEM_CEILING, max(
        _VMEM_FLOOR,
        int(1.3 * _vmem_bytes(nb, h_blk, w_blk, c_blk, th, owp, cout_pad,
                              kh * kw_eff, cin_eff, in_isz)) + (1 << 20))))

    # ---- input prep: cast to MXU dtype + pad rows/cols (+ optional lane packing).
    # XLA fuses this with the NCHW->NHWC adapter (if any) into one HBM pass.
    x_p = x.astype(compute_dtype)
    pad_h = (oh_tiles + kh - 1) - h
    pad_w = (owp + kw - 1) - w
    if pad_h or pad_w:
        x_p = jnp.pad(x_p, ((0, 0), (0, pad_h), (0, pad_w), (0, 0)))
    if pack:
        # Lane-dense repack: each output column's kw-wide window sits contiguously
        # on the lane axis -> K = kw*cin, one matmul per kh row in the kernel.
        x_p = jnp.concatenate([x_p[:, :, j:j + owp, :] for j in range(kw)], axis=-1)

    # ---- weights: (Cout, Cin, KH, KW) -> (KH*kw_eff, K, Cout_pad), compute dtype ----
    w_t = jnp.transpose(weight, (2, 3, 1, 0))                 # (KH, KW, Cin, Cout)
    if cout_pad != cout:
        w_t = jnp.pad(w_t, ((0, 0), (0, 0), (0, 0), (0, cout_pad - cout)))
    w_p = w_t.reshape(kh * kw_eff, cin_eff, cout_pad).astype(compute_dtype)

    b_p = bias.astype(jnp.float32)
    if cout_pad != cout:
        b_p = jnp.pad(b_p, (0, cout_pad - cout))
    b_p = b_p.reshape(1, cout_pad)

    kernel = functools.partial(_conv_relu_kernel, kh=kh, kw_eff=kw_eff,
                               th=th, owp=owp, cin_eff=cin_eff)

    out = pl.pallas_call(
        kernel,
        out_shape=jax.ShapeDtypeStruct((n, oh_tiles, owp, cout_pad), jnp.float32),
        grid=(n // nb, num_t),
        in_specs=[
            # Resident (padded, packed) image block: the block index ignores the
            # row-tile axis, so it is only DMA'd when the batch block changes.
            pl.BlockSpec((nb, h_blk, w_blk, c_blk), lambda b, t: (b, 0, 0, 0)),
            # Weights / bias resident for the whole grid (constant index maps).
            pl.BlockSpec((kh * kw_eff, cin_eff, cout_pad), lambda b, t: (0, 0, 0)),
            pl.BlockSpec((1, cout_pad), lambda b, t: (0, 0)),
        ],
        out_specs=pl.BlockSpec((nb, th, owp, cout_pad), lambda b, t: (b, t, 0, 0)),
        compiler_params=pltpu.CompilerParams(
            # Independent output tiles on both axes -> shard across the two
            # TensorCores on v7x; neutral on v5e/v6e.
            dimension_semantics=("parallel", "parallel"),
            vmem_limit_bytes=vmem_limit,
        ),
    )(x_p, w_p, b_p)

    return out[:, :oh, :ow, :cout]                   # drop row/col/channel padding


@functools.partial(jax.jit, static_argnames=("block_oh", "compute_dtype"))
def basic_conv2d_nhwc(x, weight, bias, *, block_oh=32, compute_dtype=jnp.bfloat16):
    """NHWC-native BasicConv2d (use this across a whole network to avoid per-conv
    NCHW<->NHWC HBM passes). x: (N,H,W,Cin); weight: (Cout,Cin,KH,KW); bias: (Cout,)."""
    return _basic_conv2d_nhwc_impl(x, weight, bias, block_oh=block_oh,
                                   compute_dtype=compute_dtype)


@functools.partial(jax.jit, static_argnames=("block_oh", "compute_dtype"))
def basic_conv2d(x, weight, bias, *, block_oh=32, compute_dtype=jnp.bfloat16):
    """PyTorch-facing wrapper: Conv2d(stride=1, padding=0) + bias + ReLU.

    x: (N, Cin, H, W) f32, weight: (Cout, Cin, KH, KW) f32, bias: (Cout,) f32
    returns (N, Cout, OH, OW) f32.  block_oh=32 is v7x-safe; 64 is fine on v5e/v6e.
    """
    x_nhwc = jnp.transpose(x, (0, 2, 3, 1))
    y = _basic_conv2d_nhwc_impl(x_nhwc, weight, bias, block_oh=block_oh,
                                compute_dtype=compute_dtype)
    return jnp.transpose(y, (0, 3, 1, 2))


def _reference(x, weight, bias):
    y = jax.lax.conv_general_dilated(
        x, weight, window_strides=(1, 1), padding="VALID",
        dimension_numbers=("NCHW", "OIHW", "NCHW"))
    return jnp.maximum(y + bias.reshape(1, -1, 1, 1), 0.0)


if __name__ == "__main__":
    key = jax.random.PRNGKey(0)

    # (N, Cin, H, W, Cout, K): small-cin 3x3 (lane-packed kw-fold path), larger-cin
    # 3x3 (per-tap path), and a 1x1 conv -- all checked against lax.conv.
    configs = [
        (2, 4, 16, 16, 8, 3),
        (2, 64, 10, 10, 32, 3),
        (2, 32, 9, 9, 16, 1),
    ]
    for idx, (N, Cin, H, W, Cout, K) in enumerate(configs):
        key, k_x, k_w, k_b = jax.random.split(key, 4)
        x = jax.random.normal(k_x, (N, Cin, H, W), dtype=jnp.float32)
        fan_in = Cin * K * K
        weight = jax.random.normal(k_w, (Cout, Cin, K, K),
                                   dtype=jnp.float32) / jnp.sqrt(fan_in)
        bias = jax.random.normal(k_b, (Cout,), dtype=jnp.float32) * 0.1

        y = basic_conv2d(x, weight, bias)
        jax.block_until_ready(y)

        y_ref = _reference(x, weight, bias)
        assert y.shape == (N, Cout, H - K + 1, W - K + 1)
        # bf16 MXU operands (f32 accumulation) -> loosened tolerance vs f32 reference.
        assert jnp.allclose(y, y_ref, atol=5e-2, rtol=5e-2), f"mismatch in config {idx}"

    print("KERNEL_OK")
</pallas_src>

<mosaic_0001>
module attributes {stable_mosaic.version = 11 : i64} {
  func.func @_conv_relu_kernel(%arg0: i32, %arg1: i32, %arg2: memref<1x16x16x12xbf16, #tpu.memory_space<vmem>>, %arg3: memref<3x12x128xbf16, #tpu.memory_space<vmem>>, %arg4: memref<1x128xf32, #tpu.memory_space<vmem>>, %arg5: memref<1x14x16x128xf32, #tpu.memory_space<vmem>>) attributes {dimension_semantics = [#tpu.dimension_semantics<parallel>, #tpu.dimension_semantics<parallel>], iteration_bounds = array<i64: 2, 1>, scalar_prefetch = 0 : i64, scratch_operands = 0 : i64, tpu.core_type = #tpu.core_type<tc>, window_params = [{transform_indices = @transform_0, window_bounds = array<i64: 1, 16, 16, 12>}, {pipeline_mode = #tpu.pipeline_mode<synchronous>, transform_indices = @transform_1, window_bounds = array<i64: 3, 12, 128>}, {pipeline_mode = #tpu.pipeline_mode<synchronous>, transform_indices = @transform_2, window_bounds = array<i64: 1, 128>}, {transform_indices = @transform_3, window_bounds = array<i64: 1, 14, 16, 128>}]} {
    %c14_i32 = arith.constant 14 : i32
    %0 = arith.muli %arg1, %c14_i32 : i32
    %1 = tpu.assume_multiple %0, 14 : i32
    %cst = arith.constant 0.000000e+00 : f32
    %2 = vector.broadcast %cst : f32 to vector<224x128xf32>
    %c0_i32 = arith.constant 0 : i32
    %3 = arith.addi %1, %c0_i32 : i32
    %c0 = arith.constant 0 : index
    %4 = arith.index_cast %3 : i32 to index
    %c0_0 = arith.constant 0 : index
    %c0_1 = arith.constant 0 : index
    %5 = vector.load %arg2[%c0, %4, %c0_0, %c0_1] : memref<1x16x16x12xbf16, #tpu.memory_space<vmem>>, vector<1x14x16x12xbf16>
    %6 = vector.shape_cast %5 : vector<1x14x16x12xbf16> to vector<224x12xbf16>
    %c0_2 = arith.constant 0 : index
    %c0_3 = arith.constant 0 : index
    %c0_4 = arith.constant 0 : index
    %7 = vector.load %arg3[%c0_2, %c0_3, %c0_4] : memref<3x12x128xbf16, #tpu.memory_space<vmem>>, vector<1x12x128xbf16>
    %8 = vector.shape_cast %7 : vector<1x12x128xbf16> to vector<12x128xbf16>
    %cst_5 = arith.constant dense<0.000000e+00> : vector<224x128xf32>
    %9 = tpu.matmul %6, %8, %cst_5 {dimension_numbers = #tpu.dot_dimension_numbers<[1], [0], [0], [1], [0, 0, 1, 1], [], []>} : vector<224x12xbf16>, vector<12x128xbf16>, vector<224x128xf32> -> vector<224x128xf32>
    %10 = arith.addf %2, %9 : vector<224x128xf32>
    %c1_i32 = arith.constant 1 : i32
    %11 = arith.addi %1, %c1_i32 : i32
    %c0_6 = arith.constant 0 : index
    %12 = arith.index_cast %11 : i32 to index
    %c0_7 = arith.constant 0 : index
    %c0_8 = arith.constant 0 : index
    %13 = vector.load %arg2[%c0_6, %12, %c0_7, %c0_8] : memref<1x16x16x12xbf16, #tpu.memory_space<vmem>>, vector<1x14x16x12xbf16>
    %14 = vector.shape_cast %13 : vector<1x14x16x12xbf16> to vector<224x12xbf16>
    %c1 = arith.constant 1 : index
    %c0_9 = arith.constant 0 : index
    %c0_10 = arith.constant 0 : index
    %15 = vector.load %arg3[%c1, %c0_9, %c0_10] : memref<3x12x128xbf16, #tpu.memory_space<vmem>>, vector<1x12x128xbf16>
    %16 = vector.shape_cast %15 : vector<1x12x128xbf16> to vector<12x128xbf16>
    %cst_11 = arith.constant dense<0.000000e+00> : vector<224x128xf32>
    %17 = tpu.matmul %14, %16, %cst_11 {dimension_numbers = #tpu.dot_dimension_numbers<[1], [0], [0], [1], [0, 0, 1, 1], [], []>} : vector<224x12xbf16>, vector<12x128xbf16>, vector<224x128xf32> -> vector<224x128xf32>
    %18 = arith.addf %10, %17 : vector<224x128xf32>
    %c2_i32 = arith.constant 2 : i32
    %19 = arith.addi %1, %c2_i32 : i32
    %c0_12 = arith.constant 0 : index
    %20 = arith.index_cast %19 : i32 to index
    %c0_13 = arith.constant 0 : index
    %c0_14 = arith.constant 0 : index
    %21 = vector.load %arg2[%c0_12, %20, %c0_13, %c0_14] : memref<1x16x16x12xbf16, #tpu.memory_space<vmem>>, vector<1x14x16x12xbf16>
    %22 = vector.shape_cast %21 : vector<1x14x16x12xbf16> to vector<224x12xbf16>
    %c2 = arith.constant 2 : index
    %c0_15 = arith.constant 0 : index
    %c0_16 = arith.constant 0 : index
    %23 = vector.load %arg3[%c2, %c0_15, %c0_16] : memref<3x12x128xbf16, #tpu.memory_space<vmem>>, vector<1x12x128xbf16>
    %24 = vector.shape_cast %23 : vector<1x12x128xbf16> to vector<12x128xbf16>
    %cst_17 = arith.constant dense<0.000000e+00> : vector<224x128xf32>
    %25 = tpu.matmul %22, %24, %cst_17 {dimension_numbers = #tpu.dot_dimension_numbers<[1], [0], [0], [1], [0, 0, 1, 1], [], []>} : vector<224x12xbf16>, vector<12x128xbf16>, vector<224x128xf32> -> vector<224x128xf32>
    %26 = arith.addf %18, %25 : vector<224x128xf32>
    %c0_18 = arith.constant 0 : index
    %c0_19 = arith.constant 0 : index
    %27 = vector.load %arg4[%c0_18, %c0_19] : memref<1x128xf32, #tpu.memory_space<vmem>>, vector<1x128xf32>
    %28 = vector.broadcast %27 : vector<1x128xf32> to vector<224x128xf32>
    %29 = arith.addf %26, %28 : vector<224x128xf32>
    %cst_20 = arith.constant 0.000000e+00 : f32
    %30 = vector.broadcast %cst_20 : f32 to vector<224x128xf32>
    %31 = arith.maximumf %29, %30 : vector<224x128xf32>
    %32 = vector.shape_cast %31 : vector<224x128xf32> to vector<1x14x16x128xf32>
    %c0_21 = arith.constant 0 : index
    %c0_22 = arith.constant 0 : index
    %c0_23 = arith.constant 0 : index
    %c0_24 = arith.constant 0 : index
    %33 = vector.load %arg5[%c0_21, %c0_22, %c0_23, %c0_24] : memref<1x14x16x128xf32, #tpu.memory_space<vmem>>, vector<1x14x16x128xf32>
    tpu.vector_store %arg5[%c0_21, %c0_22, %c0_23, %c0_24], %32 {strides = array<i32>} : memref<1x14x16x128xf32, #tpu.memory_space<vmem>>, vector<1x14x16x128xf32>,
    return
  }
  func.func @transform_0(%arg0: i32, %arg1: i32) -> (i32, i32, i32, i32) {
    %c0_i32 = arith.constant 0 : i32
    %c0_i32_0 = arith.constant 0 : i32
    %c0_i32_1 = arith.constant 0 : i32
    %c0_i32_2 = arith.constant 0 : i32
    return %arg0, %c0_i32, %c0_i32_0, %c0_i32_1 : i32, i32, i32, i32
  }
  func.func @transform_1(%arg0: i32, %arg1: i32) -> (i32, i32, i32) {
    %c0_i32 = arith.constant 0 : i32
    %c0_i32_0 = arith.constant 0 : i32
    %c0_i32_1 = arith.constant 0 : i32
    %c0_i32_2 = arith.constant 0 : i32
    return %c0_i32, %c0_i32_0, %c0_i32_1 : i32, i32, i32
  }
  func.func @transform_2(%arg0: i32, %arg1: i32) -> (i32, i32) {
    %c0_i32 = arith.constant 0 : i32
    %c0_i32_0 = arith.constant 0 : i32
    %c0_i32_1 = arith.constant 0 : i32
    return %c0_i32, %c0_i32_0 : i32, i32
  }
  func.func @transform_3(%arg0: i32, %arg1: i32) -> (i32, i32, i32, i32) {
    %c0_i32 = arith.constant 0 : i32
    %c0_i32_0 = arith.constant 0 : i32
    %c0_i32_1 = arith.constant 0 : i32
    return %arg0, %arg1, %c0_i32, %c0_i32_0 : i32, i32, i32, i32
  }
}

</mosaic_0001>

<bundles_post_ra>
// kernel: basic_conv2d.1
= control target key start
LH: loop header
LB: loop body
LE: loop exit
PB: predicated region body
PF: predicated region fallthrough
CT: control target
= control target key end

     0   :  { %s1784_s12 = smov 0   ;;  %s1786_s13 = smov 0   ;;  %s1998_s0 = inlined_call_operand.vmem [shape: bf16[2,16,16,12], index: 0, kind: input, shape index: {}]   ;;  %s1999_s1 = inlined_call_operand.vmem [shape: bf16[3,12,128], index: 1, kind: input, shape index: {}]   ;;  %s2000_s2 = inlined_call_operand.vmem [shape: f32[1,128], index: 2, kind: input, shape index: {}]   ;;  %s2001_s3 = inlined_call_operand.vmem [shape: f32[2,14,16,128], index: 3, kind: output, shape index: {}]  }
   0x1   :  { %s1788_s14 = smov 0  }
   0x2 LB: > { %s25_s15 = sadd.s32 1, %s1758_s13  ;;  %p1318_p0 = scmp.ge.s32.totalorder %s1762_s14, 1  ;;  %s1762_s14 = sphi %s1788_s14, %s13_s14   ;;  %s1758_s13 = sphi %s1786_s13, %s2003_s13   ;;  %s1754_s12 = sphi %s1784_s12, %s2002_s12  }
   0x3   : > { %p27_p1 = scmp.ge.s32.totalorder %s25_s15, 2  ;;  %p151_p2 = scmp.lt.s32.totalorder %s1762_s14, 3 }
   0x5   : > { %s2005_s15 = smov (%p27_p1, %s25_s15), 0  ;;  %p152_p3 = pnand %p1318_p0, %p151_p2 }
   0x6   : > { %vm384_vm0 = vcmask (!%p152_p3), 1045504   ;;  %p180_p4 = scmp.lt.s32.totalorder (!%p152_p3), %s1754_s12, 1  ;;  %v1695_v0 = vld [vmem:[%s1999_s1] sm:$0x3f] (!%p152_p3)   ;;  %v1696_v1 = vld [vmem:[%s1999_s1 + $0x8] sm:$0x3f] (!%p152_p3)  }
   0x7   : > { %155 = sbr.rel (%p152_p3) target bundleno = 321 (0x141), region = 32  ;;  %1667 = vmatprep.subr.msk.bf16.mxu0 (!%p152_p3), %vm384_vm0, %v1695_v0  ;;  %v651_v2 = vsel (!%p152_p3), %vm384_vm0, %v1695_v0, 0  ;;  %v1699_v3 = vld [vmem:[%s1999_s1 + $0x10] sm:$0x3f] (!%p152_p3)   ;;  %1666 = vmatprep.subr.msk.bf16.mxu1 (!%p152_p3), %vm384_vm0, %v1696_v1  ;;  %v386_v4 = vsel (!%p152_p3), %vm384_vm0, %v1696_v1, 0  ;;  %vm341_vm1 = vcmask (!%p152_p3), 97280  }
   0x8   : > { %1549 = vmatpush3.bf16.msra.mxu0 (!%p152_p3), %v651_v2  ;;  %1519 = vmatpush3.bf16.msra.mxu1 (!%p152_p3), %v386_v4  ;;  %v951_v9 = vsel (!%p152_p3), %vm384_vm0, %v1699_v3, 0  ;;  %v1922_v1 = vld [vmem:[%s2000_s2] ss:$0 sm:$0xff] (!%p152_p3) }
   0x9   : > { %1669 = vmatprep.subr.msk.bf16.mxu0 (!%p152_p3), %vm384_vm0, %v1699_v3  ;;  %1668 = vmatprep.subr.msk.bf16.mxu1 (!%p152_p3), %vm384_vm0, %v1695_v0 }
   0xe   : > { %s2007_s12 = smov (!%p180_p4, %s1754_s12), 1 }
   0xf   : > { %s1472_s22 = sshll.u32 %s2007_s12, 7  ;;  %s1670_s26 = smul.u32 224, %s2007_s12 }
  0x10   : > { %s1821_s25 = scalar_lea.vmem %s1998_s0, %s1472_s22 }
  0x11   : > { %v1697_v5 = vld [vmem:[%s1821_s25 + $0x8] sm:$0xff]   ;;  %v1698_v6 = vld [vmem:[%s1821_s25] sm:$0xff]   ;;  %v1700_v7 = vld [vmem:[%s1821_s25 + $0x10] sm:$0xff]   ;;  %s1928_s4 = scalar_lea.vmem %s2001_s3, %s1670_s26 }
  0x12   : > { %1520 = vmatprep.mubr.msk.bf16.mxu1 %vm341_vm1, %v1697_v5  ;;  %1550 = vmatprep.mubr.msk.bf16.mxu0 %vm341_vm1, %v1698_v6  ;;  %v1701_v8 = vld [vmem:[%s1821_s25 + $0x8] sm:$0xff]   ;;  %v1702_v10 = vld [vmem:[%s1821_s25 + $0x18] sm:$0xff]   ;;  %v1703_v11 = vld [vmem:[%s1821_s25 + $0x10] sm:$0xff]  }
  0x13   : > { %1521 = vmatmul.mubr.msk.bf16.vlgmr.msra.gmra.mrb[0].mxu1 %vm341_vm1, %v1700_v7  ;;  %1551 = vmatmul.mubr.msk.bf16.vlgmr.msra.gmra.mrb[0].mxu0 %vm341_vm1, %v1701_v8  ;;  %v1704_v12 = vld [vmem:[%s1821_s25 + $0x20] sm:$0xff]   ;;  %v1705_v13 = vld [vmem:[%s1821_s25 + $0x18] sm:$0xff]   ;;  %v1706_v14 = vld [vmem:[%s1821_s25 + $0x28] sm:$0xff]  }
  0x14   : > { %1609 = vmatpush3.bf16.msra.mxu1 %v651_v2  ;;  %1579 = vmatpush3.bf16.msra.mxu0 %v951_v9  ;;  %v1707_v15 = vld [vmem:[%s1821_s25 + $0x20] sm:$0xff]   ;;  %v1708_v16 = vld [vmem:[%s1821_s25 + $0x30] sm:$0xff]   ;;  %v1709_v17 = vld [vmem:[%s1821_s25 + $0x28] sm:$0xff]  }
  0x15   : > { %1524 = vmatprep.mubr.msk.bf16.mxu1 %vm341_vm1, %v1702_v10  ;;  %1554 = vmatprep.mubr.msk.bf16.mxu0 %vm341_vm1, %v1703_v11  ;;  %v1710_v18 = vld [vmem:[%s1821_s25 + $0x38] sm:$0xff]   ;;  %v1711_v19 = vld [vmem:[%s1821_s25 + $0x30] sm:$0xff]   ;;  %v1712_v20 = vld [vmem:[%s1821_s25 + $0x40] sm:$0xff]  }
  0x16   : > { %v1713_v21 = vld [vmem:[%s1821_s25 + $0x38] sm:$0xff]   ;;  %v1714_v22 = vld [vmem:[%s1821_s25 + $0x48] sm:$0xff]   ;;  %v1715_v23 = vld [vmem:[%s1821_s25 + $0x10] sm:$0xff]  }
  0x17   : > { %v1716_v24 = vld [vmem:[%s1821_s25 + $0x50] sm:$0xff]   ;;  %v1717_v25 = vld [vmem:[%s1821_s25 + $0x18] sm:$0xff]   ;;  %v1719_v27 = vld [vmem:[%s1821_s25 + $0x20] sm:$0xff]  }
  0x18   : > { %v1718_v26 = vld [vmem:[%s1821_s25 + $0x58] sm:$0xff]   ;;  %v1720_v28 = vld [vmem:[%s1821_s25 + $0x60] sm:$0xff]   ;;  %v1721_v29 = vld [vmem:[%s1821_s25 + $0x28] sm:$0xff]  }
  0x19   : > { %v1722_v30 = vld [vmem:[%s1821_s25 + $0x68] sm:$0xff]   ;;  %v1723_v31 = vld [vmem:[%s1821_s25 + $0x30] sm:$0xff]   ;;  %v1725_v33 = vld [vmem:[%s1821_s25 + $0x38] sm:$0xff]  }
  0x1a   : > { %v1724_v32 = vld [vmem:[%s1821_s25 + $0x70] sm:$0xff]   ;;  %v1726_v34 = vld [vmem:[%s1821_s25 + $0x40] sm:$0xff]   ;;  %v1728_v36 = vld [vmem:[%s1821_s25 + $0x48] sm:$0xff]  }
  0x1b   : > { %1525 = vmatmul.mubr.msk.bf16.gmra.mrb[4].mxu1 %vm341_vm1, %v1704_v12  ;;  %1555 = vmatmul.mubr.msk.bf16.gmra.mrb[4].mxu0 %vm341_vm1, %v1705_v13  ;;  %v1727_v35 = vld [vmem:[%s1821_s25 + $0x40] sm:$0xff]   ;;  %v1729_v37 = vld [vmem:[%s1821_s25 + $0x48] sm:$0xff]   ;;  %v1730_v38 = vld [vmem:[%s1821_s25 + $0x50] sm:$0xff]  }
  0x1c   : > { %1528 = vmatprep.mubr.msk.bf16.mxu1 %vm341_vm1, %v1706_v14  ;;  %1558 = vmatprep.mubr.msk.bf16.mxu0 %vm341_vm1, %v1707_v15  ;;  %v1731_v39 = vld [vmem:[%s1821_s25 + $0x50] sm:$0xff]   ;;  %v1732_v40 = vld [vmem:[%s1821_s25 + $0x58] sm:$0xff]   ;;  %v1734_v42 = vld [vmem:[%s1821_s25 + $0x60] sm:$0xff]  }
  0x1d   : > { %v1733_v41 = vld [vmem:[%s1821_s25 + $0x58] sm:$0xff]   ;;  %v1735_v43 = vld [vmem:[%s1821_s25 + $0x60] sm:$0xff]   ;;  %v1736_v44 = vld [vmem:[%s1821_s25 + $0x68] sm:$0xff]  }
  0x1e   : > { %v1737_v45 = vld [vmem:[%s1821_s25 + $0x68] sm:$0xff]   ;;  %v1738_v46 = vld [vmem:[%s1821_s25 + $0x70] sm:$0xff]   ;;  %v1739_v47 = vld [vmem:[%s1821_s25 + $0x78] sm:$0xff]  }
  0x23   : > { %1529 = vmatmul.mubr.msk.bf16.gmra.mrb[8].mxu1 %vm341_vm1, %v1708_v16  ;;  %1559 = vmatmul.mubr.msk.bf16.gmra.mrb[8].mxu0 %vm341_vm1, %v1709_v17 }
  0x24   : > { %1532 = vmatprep.mubr.msk.bf16.mxu1 %vm341_vm1, %v1710_v18  ;;  %1562 = vmatprep.mubr.msk.bf16.mxu0 %vm341_vm1, %v1711_v19 }
  0x2b   : > { %1533 = vmatmul.mubr.msk.bf16.gmra.mrb[12].mxu1 %vm341_vm1, %v1712_v20  ;;  %1563 = vmatmul.mubr.msk.bf16.gmra.mrb[12].mxu0 %vm341_vm1, %v1713_v21 }
  0x2c   : > { %1536 = vmatprep.mubr.msk.bf16.mxu1 %vm341_vm1, %v1714_v22  ;;  %1580 = vmatprep.mubr.msk.bf16.mxu0 %vm341_vm1, %v1715_v23 }
  0x33   : > { %1537 = vmatmul.mubr.msk.bf16.gmra.mrb[16].mxu1 %vm341_vm1, %v1716_v24  ;;  %1581 = vmatmul.mubr.msk.bf16.vlgmr.msra.gmra.mrb[0].mxu0 %vm341_vm1, %v1717_v25 }
  0x34   : > { %1540 = vmatprep.mubr.msk.bf16.mxu1 %vm341_vm1, %v1718_v26  ;;  %1584 = vmatprep.mubr.msk.bf16.mxu0 %vm341_vm1, %v1719_v27 }
  0x3b   : > { %1541 = vmatmul.mubr.msk.bf16.gmra.mrb[20].mxu1 %vm341_vm1, %v1720_v28  ;;  %1585 = vmatmul.mubr.msk.bf16.gmra.mrb[4].mxu0 %vm341_vm1, %v1721_v29 }
  0x3c   : > { %1544 = vmatprep.mubr.msk.bf16.mxu1 %vm341_vm1, %v1722_v30  ;;  %1588 = vmatprep.mubr.msk.bf16.mxu0 %vm341_vm1, %v1723_v31 }
  0x43   : > { %1545 = vmatmul.mubr.msk.bf16.gmra.mrb[24].mxu1 %vm341_vm1, %v1724_v32  ;;  %1589 = vmatmul.mubr.msk.bf16.gmra.mrb[8].mxu0 %vm341_vm1, %v1725_v33 }
  0x44   : > { %1566 = vmatprep.mubr.msk.bf16.mxu1 %vm341_vm1, %v1726_v34  ;;  %1592 = vmatprep.mubr.msk.bf16.mxu0 %vm341_vm1, %v1727_v35 }
  0x4b   : > { %1567 = vmatmul.mubr.msk.bf16.vlgmr.msra.gmra.mrb[16].mxu1 %vm341_vm1, %v1728_v36  ;;  %1593 = vmatmul.mubr.msk.bf16.gmra.mrb[12].mxu0 %vm341_vm1, %v1729_v37 }
  0x4c   : > { %1570 = vmatprep.mubr.msk.bf16.mxu1 %vm341_vm1, %v1730_v38  ;;  %1596 = vmatprep.mubr.msk.bf16.mxu0 %vm341_vm1, %v1731_v39 }
  0x53   : > { %1571 = vmatmul.mubr.msk.bf16.gmra.mrb[20].mxu1 %vm341_vm1, %v1732_v40  ;;  %1597 = vmatmul.mubr.msk.bf16.gmra.mrb[16].mxu0 %vm341_vm1, %v1733_v41 }
  0x54   : > { %1574 = vmatprep.mubr.msk.bf16.mxu1 %vm341_vm1, %v1734_v42  ;;  %1600 = vmatprep.mubr.msk.bf16.mxu0 %vm341_vm1, %v1735_v43 }
  0x5b   : > { %1575 = vmatmul.mubr.msk.bf16.gmra.mrb[24].mxu1 %vm341_vm1, %v1736_v44  ;;  %1601 = vmatmul.mubr.msk.bf16.gmra.mrb[20].mxu0 %vm341_vm1, %v1737_v45 }
  0x5c   : > { %1604 = vmatprep.mubr.msk.bf16.mxu0 %vm341_vm1, %v1738_v46 }
  0x63   : > { %1605 = vmatmul.mubr.msk.bf16.gmra.mrb[24].mxu0 %vm341_vm1, %v1739_v47 }
  0xe6   : > { %v1522_v48 = vpop.f32.mrb[0].mxu1 }
  0xe7   : > { %v422_v49 = vpop.f32.mrb[1].mxu1 }
  0xe8   : > { %v1523_v50 = vpop.f32.mrb[2].mxu1 }
  0xe9   : > { %v425_v51 = vpop.f32.mrb[3].mxu1 }
  0xee   : > { %v1526_v52 = vpop.f32.mrb[4].mxu1 }
  0xef   : > { %v438_v53 = vpop.f32.mrb[5].mxu1 }
  0xf0   : > { %v1527_v54 = vpop.f32.mrb[6].mxu1 }
  0xf1   : > { %v441_v55 = vpop.f32.mrb[7].mxu1 }
  0xf6   : > { %v1530_v56 = vpop.f32.mrb[8].mxu1 }
  0xf7   : > { %v454_v57 = vpop.f32.mrb[9].mxu1 }
  0xf8   : > { %v1531_v58 = vpop.f32.mrb[10].mxu1 }
  0xf9   : > { %v457_v59 = vpop.f32.mrb[11].mxu1 }
  0xfe   : > { %v1910_v60 = vpop.f32.mrb[12].mxu1 }
  0xff   : > { %v1912_v61 = vpop.f32.mrb[13].mxu1 }
 0x100   : > { %v1914_v62 = vpop.f32.mrb[14].mxu1 }
 0x101   : > { %v1916_v63 = vpop.f32.mrb[15].mxu1 }
 0x106   : > { %v1582_v0 = vpop.f32.mrb[0].mxu0 }
 0x107   : > { %v1610_v2 = vadd.f32 %v1582_v0, %v1522_v48  ;;  %v987_v3 = vpop.f32.mrb[1].mxu0 }
 0x108   : > { %v1611_v4 = vadd.f32 %v987_v3, %v422_v49  ;;  %v1583_v5 = vpop.f32.mrb[2].mxu0 }
 0x109   : > { %v1135_v6 = vadd.f32 %v1610_v2, %v1922_v1  ;;  %v1612_v7 = vadd.f32 %v1583_v5, %v1523_v50  ;;  %v990_v8 = vpop.f32.mrb[3].mxu0 }
 0x10a   : > { %v1133_v9 = vadd.f32 %v1611_v4, %v1922_v1  ;;  %v1613_v10 = vadd.f32 %v990_v8, %v425_v51 }
 0x10b   : > { %v1163_v11 = vmax.f32 %v1135_v6, 0.0  ;;  %v1136_v12 = vadd.f32 %v1612_v7, %v1922_v1 }
 0x10c   : > { %v1161_v13 = vmax.f32 %v1133_v9, 0.0  ;;  %v1134_v14 = vadd.f32 %v1613_v10, %v1922_v1 }
 0x10d   : > { %1191 = vst [vmem:[%s1928_s4 + $0x10] sm:$0xff] %v1163_v11  ;;  %v1164_v15 = vmax.f32 %v1136_v12, 0.0 }
 0x10e   : > { %1189 = vst [vmem:[%s1928_s4] sm:$0xff] %v1161_v13  ;;  %v1162_v16 = vmax.f32 %v1134_v14, 0.0  ;;  %v1586_v17 = vpop.f32.mrb[4].mxu0 }
 0x10f   : > { %1192 = vst [vmem:[%s1928_s4 + $0x18] sm:$0xff] %v1164_v15  ;;  %v1614_v18 = vadd.f32 %v1586_v17, %v1526_v52  ;;  %v1003_v19 = vpop.f32.mrb[5].mxu0 }
 0x110   : > { %1190 = vst [vmem:[%s1928_s4 + $0x8] sm:$0xff] %v1162_v16  ;;  %v1615_v20 = vadd.f32 %v1003_v19, %v438_v53  ;;  %v1587_v21 = vpop.f32.mrb[6].mxu0 }
 0x111   : > { %v1139_v22 = vadd.f32 %v1614_v18, %v1922_v1  ;;  %v1616_v23 = vadd.f32 %v1587_v21, %v1527_v54  ;;  %v1006_v24 = vpop.f32.mrb[7].mxu0 }
 0x112   : > { %v1137_v25 = vadd.f32 %v1615_v20, %v1922_v1  ;;  %v1617_v26 = vadd.f32 %v1006_v24, %v441_v55 }
 0x113   : > { %v1167_v27 = vmax.f32 %v1139_v22, 0.0  ;;  %v1140_v28 = vadd.f32 %v1616_v23, %v1922_v1 }
 0x114   : > { %v1165_v29 = vmax.f32 %v1137_v25, 0.0  ;;  %v1138_v30 = vadd.f32 %v1617_v26, %v1922_v1 }
 0x115   : > { %1195 = vst [vmem:[%s1928_s4 + $0x30] sm:$0xff] %v1167_v27  ;;  %v1168_v31 = vmax.f32 %v1140_v28, 0.0 }
 0x116   : > { %1193 = vst [vmem:[%s1928_s4 + $0x20] sm:$0xff] %v1165_v29  ;;  %v1166_v32 = vmax.f32 %v1138_v30, 0.0  ;;  %v1590_v33 = vpop.f32.mrb[8].mxu0 }
 0x117   : > { %1196 = vst [vmem:[%s1928_s4 + $0x38] sm:$0xff] %v1168_v31  ;;  %v1618_v34 = vadd.f32 %v1590_v33, %v1530_v56  ;;  %v1019_v35 = vpop.f32.mrb[9].mxu0 }
 0x118   : > { %1194 = vst [vmem:[%s1928_s4 + $0x28] sm:$0xff] %v1166_v32  ;;  %v1619_v36 = vadd.f32 %v1019_v35, %v454_v57  ;;  %v1591_v37 = vpop.f32.mrb[10].mxu0 }
 0x119   : > { %v1143_v38 = vadd.f32 %v1618_v34, %v1922_v1  ;;  %v1620_v39 = vadd.f32 %v1591_v37, %v1531_v58  ;;  %v1022_v40 = vpop.f32.mrb[11].mxu0 }
 0x11a   : > { %v1141_v41 = vadd.f32 %v1619_v36, %v1922_v1  ;;  %v1621_v42 = vadd.f32 %v1022_v40, %v457_v59 }
 0x11b   : > { %v1171_v43 = vmax.f32 %v1143_v38, 0.0  ;;  %v1144_v44 = vadd.f32 %v1620_v39, %v1922_v1 }
 0x11c   : > { %v1169_v45 = vmax.f32 %v1141_v41, 0.0  ;;  %v1142_v46 = vadd.f32 %v1621_v42, %v1922_v1 }
 0x11d   : > { %1199 = vst [vmem:[%s1928_s4 + $0x50] sm:$0xff] %v1171_v43  ;;  %v1172_v47 = vmax.f32 %v1144_v44, 0.0 }
 0x11e   : > { %v1568_v48 = vpop.f32.mrb[16].mxu1  ;;  %1197 = vst [vmem:[%s1928_s4 + $0x40] sm:$0xff] %v1169_v45  ;;  %v1170_v49 = vmax.f32 %v1142_v46, 0.0  ;;  %v1594_v50 = vpop.f32.mrb[12].mxu0 }
 0x11f   : > { %v751_v51 = vpop.f32.mrb[17].mxu1  ;;  %1200 = vst [vmem:[%s1928_s4 + $0x58] sm:$0xff] %v1172_v47  ;;  %v1622_v52 = vadd.f32 %v1594_v50, %v1910_v60  ;;  %v1035_v53 = vpop.f32.mrb[13].mxu0 }
 0x120   : > { %v1569_v54 = vpop.f32.mrb[18].mxu1  ;;  %1198 = vst [vmem:[%s1928_s4 + $0x48] sm:$0xff] %v1170_v49  ;;  %v1623_v55 = vadd.f32 %v1035_v53, %v1912_v61  ;;  %v1595_v56 = vpop.f32.mrb[14].mxu0 }
 0x121   : > { %v754_v57 = vpop.f32.mrb[19].mxu1  ;;  %v1147_v58 = vadd.f32 %v1622_v52, %v1922_v1  ;;  %v1624_v59 = vadd.f32 %v1595_v56, %v1914_v62  ;;  %v1038_v0 = vpop.f32.mrb[15].mxu0 }
 0x122   : > { %v1145_v2 = vadd.f32 %v1623_v55, %v1922_v1  ;;  %v1625_v3 = vadd.f32 %v1038_v0, %v1916_v63 }
 0x123   : > { %v1175_v60 = vmax.f32 %v1147_v58, 0.0  ;;  %v1148_v4 = vadd.f32 %v1624_v59, %v1922_v1 }
 0x124   : > { %v1173_v5 = vmax.f32 %v1145_v2, 0.0  ;;  %v1146_v6 = vadd.f32 %v1625_v3, %v1922_v1 }
 0x125   : > { %1203 = vst [vmem:[%s1928_s4 + $0x70] sm:$0xff] %v1175_v60  ;;  %v1176_v61 = vmax.f32 %v1148_v4, 0.0 }
 0x126   : > { %v1572_v7 = vpop.f32.mrb[20].mxu1  ;;  %1201 = vst [vmem:[%s1928_s4 + $0x60] sm:$0xff] %v1173_v5  ;;  %v1174_v8 = vmax.f32 %v1146_v6, 0.0  ;;  %v1598_v9 = vpop.f32.mrb[16].mxu0 }
 0x127   : > { %v767_v10 = vpop.f32.mrb[21].mxu1  ;;  %1204 = vst [vmem:[%s1928_s4 + $0x78] sm:$0xff] %v1176_v61  ;;  %v1626_v62 = vadd.f32 %v1598_v9, %v1568_v48  ;;  %v1051_v11 = vpop.f32.mrb[17].mxu0 }
 0x128   : > { %v1573_v12 = vpop.f32.mrb[22].mxu1  ;;  %1202 = vst [vmem:[%s1928_s4 + $0x68] sm:$0xff] %v1174_v8  ;;  %v1627_v63 = vadd.f32 %v1051_v11, %v751_v51  ;;  %v1599_v13 = vpop.f32.mrb[18].mxu0 }
 0x129   : > { %v770_v14 = vpop.f32.mrb[23].mxu1  ;;  %v1151_v15 = vadd.f32 %v1626_v62, %v1922_v1  ;;  %v1628_v16 = vadd.f32 %v1599_v13, %v1569_v54  ;;  %v1054_v17 = vpop.f32.mrb[19].mxu0 }
 0x12a   : > { %v1149_v18 = vadd.f32 %v1627_v63, %v1922_v1  ;;  %v1629_v19 = vadd.f32 %v1054_v17, %v754_v57 }
 0x12b   : > { %v1179_v20 = vmax.f32 %v1151_v15, 0.0  ;;  %v1152_v21 = vadd.f32 %v1628_v16, %v1922_v1 }
 0x12c   : > { %v1177_v22 = vmax.f32 %v1149_v18, 0.0  ;;  %v1150_v23 = vadd.f32 %v1629_v19, %v1922_v1 }
 0x12d   : > { %1207 = vst [vmem:[%s1928_s4 + $0x90] sm:$0xff] %v1179_v20  ;;  %v1180_v24 = vmax.f32 %v1152_v21, 0.0 }
 0x12e   : > { %v1576_v25 = vpop.f32.mrb[24].mxu1  ;;  %1205 = vst [vmem:[%s1928_s4 + $0x80] sm:$0xff] %v1177_v22  ;;  %v1178_v26 = vmax.f32 %v1150_v23, 0.0  ;;  %v1602_v27 = vpop.f32.mrb[20].mxu0 }
 0x12f   : > { %v783_v28 = vpop.f32.mrb[25].mxu1  ;;  %1208 = vst [vmem:[%s1928_s4 + $0x98] sm:$0xff] %v1180_v24  ;;  %v1630_v29 = vadd.f32 %v1602_v27, %v1572_v7  ;;  %v1067_v30 = vpop.f32.mrb[21].mxu0 }
 0x130   : > { %v1577_v31 = vpop.f32.mrb[26].mxu1  ;;  %1206 = vst [vmem:[%s1928_s4 + $0x88] sm:$0xff] %v1178_v26  ;;  %v1631_v32 = vadd.f32 %v1067_v30, %v767_v10  ;;  %v1603_v33 = vpop.f32.mrb[22].mxu0 }
 0x131   : > { %v786_v34 = vpop.f32.mrb[27].mxu1  ;;  %v1155_v35 = vadd.f32 %v1630_v29, %v1922_v1  ;;  %v1632_v36 = vadd.f32 %v1603_v33, %v1573_v12  ;;  %v1070_v37 = vpop.f32.mrb[23].mxu0 }
 0x132   : > { %v1153_v38 = vadd.f32 %v1631_v32, %v1922_v1  ;;  %v1633_v39 = vadd.f32 %v1070_v37, %v770_v14 }
 0x133   : > { %v1183_v40 = vmax.f32 %v1155_v35, 0.0  ;;  %v1156_v41 = vadd.f32 %v1632_v36, %v1922_v1 }
 0x134   : > { %v1181_v42 = vmax.f32 %v1153_v38, 0.0  ;;  %v1154_v43 = vadd.f32 %v1633_v39, %v1922_v1 }
 0x135   : > { %1211 = vst [vmem:[%s1928_s4 + $0xb0] sm:$0xff] %v1183_v40  ;;  %v1184_v44 = vmax.f32 %v1156_v41, 0.0 }
 0x136   : > { %1209 = vst [vmem:[%s1928_s4 + $0xa0] sm:$0xff] %v1181_v42  ;;  %v1182_v45 = vmax.f32 %v1154_v43, 0.0  ;;  %v1606_v46 = vpop.f32.mrb[24].mxu0 }
 0x137   : > { %1212 = vst [vmem:[%s1928_s4 + $0xb8] sm:$0xff] %v1184_v44  ;;  %v1634_v47 = vadd.f32 %v1606_v46, %v1576_v25  ;;  %v1083_v48 = vpop.f32.mrb[25].mxu0 }
 0x138   : > { %1210 = vst [vmem:[%s1928_s4 + $0xa8] sm:$0xff] %v1182_v45  ;;  %v1635_v49 = vadd.f32 %v1083_v48, %v783_v28  ;;  %v1607_v50 = vpop.f32.mrb[26].mxu0 }
 0x139   : > { %v1159_v51 = vadd.f32 %v1634_v47, %v1922_v1  ;;  %v1636_v52 = vadd.f32 %v1607_v50, %v1577_v31  ;;  %v1086_v53 = vpop.f32.mrb[27].mxu0 }
 0x13a   : > { %v1157_v54 = vadd.f32 %v1635_v49, %v1922_v1  ;;  %v1637_v55 = vadd.f32 %v1086_v53, %v786_v34 }
 0x13b   : > { %v1187_v56 = vmax.f32 %v1159_v51, 0.0  ;;  %v1160_v57 = vadd.f32 %v1636_v52, %v1922_v1 }
 0x13c   : > { %v1185_v58 = vmax.f32 %v1157_v54, 0.0  ;;  %v1158_v59 = vadd.f32 %v1637_v55, %v1922_v1 }
 0x13d   : > { %1215 = vst [vmem:[%s1928_s4 + $0xd0] sm:$0xff] %v1187_v56  ;;  %v1188_v0 = vmax.f32 %v1160_v57, 0.0 }
 0x13e   : > { %1213 = vst [vmem:[%s1928_s4 + $0xc0] sm:$0xff] %v1185_v58  ;;  %v1186_v2 = vmax.f32 %v1158_v59, 0.0 }
 0x13f   : > { %1216 = vst [vmem:[%s1928_s4 + $0xd8] sm:$0xff] %v1188_v0 }
 0x140   : > { %1214 = vst [vmem:[%s1928_s4 + $0xc8] sm:$0xff] %v1186_v2 }
 0x141 PF: > { %s13_s14 = sadd.s32 1, %s1762_s14   ;;  %s2002_s12 = smov %s1758_s13 }
 0x142   : > { %p10_p5 = scmp.ge.s32.totalorder %s13_s14, 4   ;;  %s2003_s13 = smov %s2005_s15 }
 0x144   :  { %12 = sbr.rel (!%p10_p5) target bundleno = 2 (0x2), region = 67 }

</bundles_post_ra>
